<compile_context>
chip_gen: v6e
topology: v6e:2x2x1
jax: 0.10.0
libtpu: 0.0.40
codegen_flags: <defaults>
</compile_context>

<pallas_src>
import functools

import numpy as np
import jax
import jax.numpy as jnp
from jax import lax
from jax.experimental import pallas as pl
from jax.experimental.pallas import tpu as pltpu


def _round_up(x, m):
    return (x + m - 1) // m * m


def _wassa_kernel(x_ref, wenc_ref, wdec_ref, out_ref, est_ref, *,
                  K, C_in, C_out, L_out, L_seg, output_mode):
    x = x_ref[...]                         # (C_in, W)  W = B_blk * L_seg
    wenc = wenc_ref[...]                   # (C_out + 1, K * C_in)
    wdec = wdec_ref[...]                   # (K * C_in, C_out + 1)
    W = x.shape[1]
    B_blk = W // L_seg

    # ---- im2col across taps only (batch already rides the lane axis): ----
    #   wins[k*C_in + c, p] = x[c, p + k]   (lane roll -> XLU, not ld/st slots)
    taps = [x if k == 0 else pltpu.roll(x, shift=W - k, axis=1) for k in range(K)]
    wins = taps[0] if K == 1 else jnp.concatenate(taps, axis=0)    # (K*C_in, W)

    # ---- encode: ONE MXU matmul for the whole batch block (bias row fused) ----
    fa = jnp.dot(wenc, wins, preferred_element_type=jnp.float32)   # (C_out+1, W)

    factors = fa[:C_out]
    if output_mode == 'linear':
        act = factors
    elif output_mode == 'sigmoid':
        act = jax.nn.sigmoid(factors)
    elif output_mode == 'softmax':
        m = jnp.max(factors, axis=0, keepdims=True)
        e = jnp.exp(factors - m)
        act = e / jnp.sum(e, axis=0, keepdims=True)
    else:
        raise ValueError(f'unknown output mode {output_mode}')

    # Per-sample validity mask: lane t of each L_seg segment is a real output
    # column iff t < L_out.  Built from a (1, L_seg) iota tiled along lanes
    # (tile-aligned, zero HBM cost); zeros out padded columns before decode.
    seg_col = lax.broadcasted_iota(jnp.int32, (1, L_seg), 1)
    seg_valid = (seg_col < L_out).astype(jnp.float32)
    valid = seg_valid if B_blk == 1 else jnp.tile(seg_valid, (1, B_blk))

    out_aug = jnp.concatenate([act, fa[C_out:C_out + 1]], axis=0) * valid

    out_ref[...] = out_aug[:C_out].astype(out_ref.dtype)

    # ---- decode: ONE MXU matmul + K-fold overlap-add via lane rolls ----
    contrib = jnp.dot(wdec, out_aug.astype(wdec.dtype),
                      preferred_element_type=jnp.float32)          # (K*C_in, W)
    est = contrib[0:C_in]
    for k in range(1, K):
        est = est + pltpu.roll(contrib[k * C_in:(k + 1) * C_in], shift=k, axis=1)
    est_ref[...] = est.astype(est_ref.dtype)


def wassa_forward(x, decoding_weights, flat_k=None, bias=None, *,
                  output='linear', do_bias=False, compute_dtype=jnp.float32):
    """Pallas implementation of WassA.forward.

    x:                (N, C_in, L)      float32   (torch NCW layout)
    decoding_weights: (C_out, C_in, K)  float32
    flat_k:           (1, C_in, K)      float32   (only if do_bias)
    bias:             (1,)              float32   (only if do_bias)
    returns (output (N, C_out, L-K+1), estimated_input (N, C_in, L))
    """
    N, C_in, L = x.shape
    C_out, C_in_w, K = decoding_weights.shape
    assert C_in_w == C_in
    L_out = L - K + 1
    assert L_out >= 1
    if output not in ('linear', 'sigmoid', 'softmax'):
        raise ValueError(f'unknown output mode {output}')

    L_seg = _round_up(L, 128)          # per-sample lane segment (covers L and L_out)

    # ---- layout glue (wrapper-side XLA): batch into the lane axis ----
    x_p = jnp.pad(x, ((0, 0), (0, 0), (0, L_seg - L)))
    x2 = jnp.transpose(x_p, (1, 0, 2)).reshape(C_in, N * L_seg).astype(compute_dtype)

    # Weight prep: im2col rows are ordered k-major, c-minor.
    #   encode: w_enc[o, k*C_in + c]  = W[o, c, k]
    #   decode: w_dec[k*C_in + c, o]  = W[o, c, k]
    w_enc = jnp.transpose(decoding_weights, (0, 2, 1)).reshape(C_out, K * C_in)
    w_dec = jnp.transpose(decoding_weights, (2, 1, 0)).reshape(K * C_in, C_out)
    if do_bias:
        fk_row = jnp.transpose(flat_k, (0, 2, 1)).reshape(1, K * C_in)
        fk_col = jnp.transpose(flat_k, (2, 1, 0)).reshape(K * C_in, 1)
        w_enc_aug = jnp.concatenate([w_enc, fk_row], axis=0)
        w_dec_aug = jnp.concatenate([w_dec, bias[0] * fk_col], axis=1)
    else:
        w_enc_aug = jnp.concatenate(
            [w_enc, jnp.zeros((1, K * C_in), w_enc.dtype)], axis=0)
        w_dec_aug = jnp.concatenate(
            [w_dec, jnp.zeros((K * C_in, 1), w_dec.dtype)], axis=1)
    w_enc_aug = w_enc_aug.astype(compute_dtype)
    w_dec_aug = w_dec_aug.astype(compute_dtype)

    # ---- batch blocking / VMEM budget (intermediates + double buffering) ----
    itemsize = jnp.dtype(compute_dtype).itemsize
    per_sample_bytes = L_seg * (
        2 * itemsize * C_in                 # x block (2-deep pipeline)
        + 2 * 4 * (C_out + C_in)            # out + est blocks (2-deep, f32)
        + itemsize * K * C_in               # wins
        + 4 * K * C_in                      # contrib
        + 4 * 2 * (C_out + 1)               # fa + out_aug
        + 4 * 2 * C_in)                     # est accumulator + rolled temp
    BLOCK_BUDGET = 24 * 1024 * 1024         # conservative across v5e/v6e/v7x

    B_blk = 1
    for b in range(N, 0, -1):
        if N % b != 0 or b * per_sample_bytes > BLOCK_BUDGET:
            continue
        if N // b >= 2 or N == 1:           # keep >=2 grid steps for v7x's 2 TCs
            B_blk = b
            break
    grid = (N // B_blk,)
    W_blk = B_blk * L_seg

    weight_bytes = 2 * 2 * itemsize * (C_out + 1) * (K * C_in)
    vmem_limit = int(min(max(B_blk * per_sample_bytes + weight_bytes + (2 << 20),
                             8 * 1024 * 1024),
                         48 * 1024 * 1024))   # stay well under v7x's 64 MiB/TC

    flops = 2 * 2 * N * (C_out + 1) * (K * C_in) * L_out          # enc + dec matmuls
    transcendentals = 0 if output == 'linear' else N * C_out * L_out
    bytes_accessed = int(x2.size * itemsize
                         + (C_out + C_in) * N * L_seg * 4
                         + 2 * (C_out + 1) * (K * C_in) * itemsize)

    kernel = functools.partial(
        _wassa_kernel, K=K, C_in=C_in, C_out=C_out, L_out=L_out,
        L_seg=L_seg, output_mode=output)

    out2, est2 = pl.pallas_call(
        kernel,
        out_shape=(
            jax.ShapeDtypeStruct((C_out, N * L_seg), jnp.float32),
            jax.ShapeDtypeStruct((C_in, N * L_seg), jnp.float32),
        ),
        grid=grid,
        in_specs=[
            pl.BlockSpec((C_in, W_blk), lambda n: (0, n)),
            pl.BlockSpec((C_out + 1, K * C_in), lambda n: (0, 0)),
            pl.BlockSpec((K * C_in, C_out + 1), lambda n: (0, 0)),
        ],
        out_specs=(
            pl.BlockSpec((C_out, W_blk), lambda n: (0, n)),
            pl.BlockSpec((C_in, W_blk), lambda n: (0, n)),
        ),
        compiler_params=pltpu.CompilerParams(
            dimension_semantics=("parallel",),
            vmem_limit_bytes=vmem_limit),
        cost_estimate=pl.CostEstimate(
            flops=flops, transcendentals=transcendentals,
            bytes_accessed=bytes_accessed),
    )(x2, w_enc_aug, w_dec_aug)

    # ---- undo the layout glue; slice off the lane padding ----
    out = jnp.transpose(out2.reshape(C_out, N, L_seg), (1, 0, 2))[:, :, :L_out]
    est = jnp.transpose(est2.reshape(C_in, N, L_seg), (1, 0, 2))[:, :, :L]
    return out, est


def _ref_forward(x, w, fk, bias, output_mode, do_bias):
    """Literal numpy transcription of the PyTorch forward (for verification)."""
    x = np.asarray(x, np.float32)
    w = np.asarray(w, np.float32)
    N, C_in, L = x.shape
    C_out, _, K = w.shape
    L_out = L - K + 1

    factors = np.zeros((N, C_out, L_out), np.float32)
    for n in range(N):
        for o in range(C_out):
            for t in range(L_out):
                factors[n, o, t] = np.sum(w[o] * x[n, :, t:t + K])

    if output_mode == 'linear':
        out = factors
    elif output_mode == 'sigmoid':
        out = 1.0 / (1.0 + np.exp(-factors))
    elif output_mode == 'softmax':
        m = factors.max(axis=1, keepdims=True)
        e = np.exp(factors - m)
        out = e / e.sum(axis=1, keepdims=True)
    else:
        raise ValueError(output_mode)

    est = np.zeros((N, C_in, L), np.float32)
    for n in range(N):
        for o in range(C_out):
            for t in range(L_out):
                est[n, :, t:t + K] += out[n, o, t] * w[o]

    if do_bias:
        fk = np.asarray(fk, np.float32)
        b = float(np.asarray(bias)[0])
        bact = np.zeros((N, L_out), np.float32)
        for n in range(N):
            for t in range(L_out):
                bact[n, t] = b * np.sum(fk[0] * x[n, :, t:t + K])
        for n in range(N):
            for t in range(L_out):
                est[n, :, t:t + K] += bact[n, t] * fk[0]
    return out, est


if __name__ == "__main__":
    key = jax.random.PRNGKey(0)
    k_w, k_x, k_w2, k_x2 = jax.random.split(key, 4)

    # ---- config 1: softmax + bias (module's do_bias branch); N=2 -> 2 grid steps ----
    N, C_in, L = 2, 4, 32
    C_out, K = 6, 5
    w = jax.random.uniform(k_w, (C_out, C_in, K), dtype=jnp.float32)
    w = w / jnp.linalg.norm(w, ord=2, axis=(1, 2))[:, None, None]
    flat_k = jnp.ones((1, C_in, K), jnp.float32) / jnp.sqrt(jnp.float32(C_in * K))
    bias = jnp.ones((1,), jnp.float32)
    x = jax.random.normal(k_x, (N, C_in, L), dtype=jnp.float32)

    out, est = wassa_forward(x, w, flat_k, bias, output='softmax', do_bias=True)
    jax.block_until_ready((out, est))
    out_r, est_r = _ref_forward(x, w, flat_k, bias, 'softmax', True)
    np.testing.assert_allclose(np.asarray(out), out_r, atol=5e-3, rtol=5e-3)
    np.testing.assert_allclose(np.asarray(est), est_r, atol=5e-3, rtol=5e-3)

    # ---- config 2: sigmoid, no bias; N=4 -> batch-fused block (B_blk=2), 2 steps ----
    N2, C_in2, L2, C_out2, K2 = 4, 4, 16, 3, 3
    w2 = jax.random.uniform(k_w2, (C_out2, C_in2, K2), dtype=jnp.float32)
    w2 = w2 / jnp.linalg.norm(w2, ord=2, axis=(1, 2))[:, None, None]
    x2 = jax.random.normal(k_x2, (N2, C_in2, L2), dtype=jnp.float32)

    out2, est2 = wassa_forward(x2, w2, output='sigmoid', do_bias=False)
    jax.block_until_ready((out2, est2))
    out2_r, est2_r = _ref_forward(x2, w2, None, None, 'sigmoid', False)
    np.testing.assert_allclose(np.asarray(out2), out2_r, atol=5e-3, rtol=5e-3)
    np.testing.assert_allclose(np.asarray(est2), est2_r, atol=5e-3, rtol=5e-3)

    # ---- config 3: same data, bf16 compute path (v6e/v7x memory-bound regime) ----
    out3, est3 = wassa_forward(x2, w2, output='sigmoid', do_bias=False,
                               compute_dtype=jnp.bfloat16)
    jax.block_until_ready((out3, est3))
    np.testing.assert_allclose(np.asarray(out3), out2_r, atol=5e-2, rtol=5e-2)
    np.testing.assert_allclose(np.asarray(est3), est2_r, atol=5e-2, rtol=5e-2)

    print("KERNEL_OK")
</pallas_src>

<mosaic_0001>
module attributes {stable_mosaic.version = 11 : i64} {
  func.func @_wassa_kernel(%arg0: i32, %arg1: memref<4x128xf32, #tpu.memory_space<vmem>>, %arg2: memref<7x20xf32, #tpu.memory_space<vmem>>, %arg3: memref<20x7xf32, #tpu.memory_space<vmem>>, %arg4: memref<6x128xf32, #tpu.memory_space<vmem>>, %arg5: memref<4x128xf32, #tpu.memory_space<vmem>>) attributes {dimension_semantics = [#tpu.dimension_semantics<parallel>], iteration_bounds = array<i64: 2>, scalar_prefetch = 0 : i64, scratch_operands = 0 : i64, tpu.core_type = #tpu.core_type<tc>, window_params = [{transform_indices = @transform_0, window_bounds = array<i64: 4, 128>}, {pipeline_mode = #tpu.pipeline_mode<synchronous>, transform_indices = @transform_1, window_bounds = array<i64: 7, 20>}, {pipeline_mode = #tpu.pipeline_mode<synchronous>, transform_indices = @transform_2, window_bounds = array<i64: 20, 7>}, {transform_indices = @transform_3, window_bounds = array<i64: 6, 128>}, {transform_indices = @transform_4, window_bounds = array<i64: 4, 128>}]} {
    %c0 = arith.constant 0 : index
    %c0_0 = arith.constant 0 : index
    %0 = vector.load %arg1[%c0, %c0_0] : memref<4x128xf32, #tpu.memory_space<vmem>>, vector<4x128xf32>
    %c0_1 = arith.constant 0 : index
    %c0_2 = arith.constant 0 : index
    %1 = vector.load %arg2[%c0_1, %c0_2] : memref<7x20xf32, #tpu.memory_space<vmem>>, vector<7x20xf32>
    %c0_3 = arith.constant 0 : index
    %c0_4 = arith.constant 0 : index
    %2 = vector.load %arg3[%c0_3, %c0_4] : memref<20x7xf32, #tpu.memory_space<vmem>>, vector<20x7xf32>
    %c127_i32 = arith.constant 127 : i32
    %3 = tpu.dynamic_rotate %0 by %c127_i32 dim 1 : vector<4x128xf32>, i32 -> vector<4x128xf32>
    %c126_i32 = arith.constant 126 : i32
    %4 = tpu.dynamic_rotate %0 by %c126_i32 dim 1 : vector<4x128xf32>, i32 -> vector<4x128xf32>
    %c125_i32 = arith.constant 125 : i32
    %5 = tpu.dynamic_rotate %0 by %c125_i32 dim 1 : vector<4x128xf32>, i32 -> vector<4x128xf32>
    %c124_i32 = arith.constant 124 : i32
    %6 = tpu.dynamic_rotate %0 by %c124_i32 dim 1 : vector<4x128xf32>, i32 -> vector<4x128xf32>
    %7 = tpu.concatenate %0, %3, %4, %5, %6 in 0 : vector<4x128xf32>, vector<4x128xf32>, vector<4x128xf32>, vector<4x128xf32>, vector<4x128xf32> -> vector<20x128xf32>
    %cst = arith.constant dense<0.000000e+00> : vector<7x128xf32>
    %8 = tpu.matmul %1, %7, %cst {dimension_numbers = #tpu.dot_dimension_numbers<[1], [0], [0], [1], [0, 0, 1, 1], [], []>} : vector<7x20xf32>, vector<20x128xf32>, vector<7x128xf32> -> vector<7x128xf32>
    %9 = vector.extract_strided_slice %8 {offsets = [0, 0], sizes = [6, 128], strides = [1, 1]} : vector<7x128xf32> to vector<6x128xf32>
    %cst_5 = arith.constant dense<0xFF800000> : vector<128xf32>
    %10 = vector.multi_reduction <maximumf>, %9, %cst_5 [0] : vector<6x128xf32> to vector<128xf32>
    %11 = vector.shape_cast %10 : vector<128xf32> to vector<1x128xf32>
    %12 = vector.broadcast %11 : vector<1x128xf32> to vector<6x128xf32>
    %13 = arith.subf %9, %12 : vector<6x128xf32>
    %14 = math.exp %13 : vector<6x128xf32>
    %cst_6 = arith.constant dense<0.000000e+00> : vector<128xf32>
    %15 = vector.multi_reduction <add>, %14, %cst_6 [0] : vector<6x128xf32> to vector<128xf32>
    %16 = vector.shape_cast %15 : vector<128xf32> to vector<1x128xf32>
    %17 = vector.broadcast %16 : vector<1x128xf32> to vector<6x128xf32>
    %18 = arith.divf %14, %17 : vector<6x128xf32>
    %19 = tpu.iota {dimensions = array<i32: 1>} : vector<1x128xi32>
    %c28_i32 = arith.constant 28 : i32
    %20 = vector.broadcast %c28_i32 : i32 to vector<1x128xi32>
    %21 = arith.cmpi slt, %19, %20 : vector<1x128xi32>
    %22 = arith.extui %21 : vector<1x128xi1> to vector<1x128xi32>
    %23 = arith.sitofp %22 : vector<1x128xi32> to vector<1x128xf32>
    %24 = vector.extract_strided_slice %8 {offsets = [6, 0], sizes = [1, 128], strides = [1, 1]} : vector<7x128xf32> to vector<1x128xf32>
    %25 = tpu.concatenate %18, %24 in 0 : vector<6x128xf32>, vector<1x128xf32> -> vector<7x128xf32>
    %26 = vector.broadcast %23 : vector<1x128xf32> to vector<7x128xf32>
    %27 = arith.mulf %25, %26 : vector<7x128xf32>
    %28 = vector.extract_strided_slice %27 {offsets = [0, 0], sizes = [6, 128], strides = [1, 1]} : vector<7x128xf32> to vector<6x128xf32>
    %c0_7 = arith.constant 0 : index
    %c0_8 = arith.constant 0 : index
    %29 = vector.load %arg4[%c0_7, %c0_8] : memref<6x128xf32, #tpu.memory_space<vmem>>, vector<6x128xf32>
    tpu.vector_store %arg4[%c0_7, %c0_8], %28 {strides = array<i32>} : memref<6x128xf32, #tpu.memory_space<vmem>>, vector<6x128xf32>,
    %cst_9 = arith.constant dense<0.000000e+00> : vector<20x128xf32>
    %30 = tpu.matmul %2, %27, %cst_9 {dimension_numbers = #tpu.dot_dimension_numbers<[1], [0], [0], [1], [0, 0, 1, 1], [], []>} : vector<20x7xf32>, vector<7x128xf32>, vector<20x128xf32> -> vector<20x128xf32>
    %31 = vector.extract_strided_slice %30 {offsets = [0, 0], sizes = [4, 128], strides = [1, 1]} : vector<20x128xf32> to vector<4x128xf32>
    %32 = vector.extract_strided_slice %30 {offsets = [4, 0], sizes = [4, 128], strides = [1, 1]} : vector<20x128xf32> to vector<4x128xf32>
    %c1_i32 = arith.constant 1 : i32
    %33 = tpu.dynamic_rotate %32 by %c1_i32 dim 1 : vector<4x128xf32>, i32 -> vector<4x128xf32>
    %34 = arith.addf %31, %33 : vector<4x128xf32>
    %35 = vector.extract_strided_slice %30 {offsets = [8, 0], sizes = [4, 128], strides = [1, 1]} : vector<20x128xf32> to vector<4x128xf32>
    %c2_i32 = arith.constant 2 : i32
    %36 = tpu.dynamic_rotate %35 by %c2_i32 dim 1 : vector<4x128xf32>, i32 -> vector<4x128xf32>
    %37 = arith.addf %34, %36 : vector<4x128xf32>
    %38 = vector.extract_strided_slice %30 {offsets = [12, 0], sizes = [4, 128], strides = [1, 1]} : vector<20x128xf32> to vector<4x128xf32>
    %c3_i32 = arith.constant 3 : i32
    %39 = tpu.dynamic_rotate %38 by %c3_i32 dim 1 : vector<4x128xf32>, i32 -> vector<4x128xf32>
    %40 = arith.addf %37, %39 : vector<4x128xf32>
    %41 = vector.extract_strided_slice %30 {offsets = [16, 0], sizes = [4, 128], strides = [1, 1]} : vector<20x128xf32> to vector<4x128xf32>
    %c4_i32 = arith.constant 4 : i32
    %42 = tpu.dynamic_rotate %41 by %c4_i32 dim 1 : vector<4x128xf32>, i32 -> vector<4x128xf32>
    %43 = arith.addf %40, %42 : vector<4x128xf32>
    %c0_10 = arith.constant 0 : index
    %c0_11 = arith.constant 0 : index
    %44 = vector.load %arg5[%c0_10, %c0_11] : memref<4x128xf32, #tpu.memory_space<vmem>>, vector<4x128xf32>
    tpu.vector_store %arg5[%c0_10, %c0_11], %43 {strides = array<i32>} : memref<4x128xf32, #tpu.memory_space<vmem>>, vector<4x128xf32>,
    return
  }
  func.func @transform_0(%arg0: i32) -> (i32, i32) {
    %c0_i32 = arith.constant 0 : i32
    %c0_i32_0 = arith.constant 0 : i32
    return %c0_i32, %arg0 : i32, i32
  }
  func.func @transform_1(%arg0: i32) -> (i32, i32) {
    %c0_i32 = arith.constant 0 : i32
    %c0_i32_0 = arith.constant 0 : i32
    %c0_i32_1 = arith.constant 0 : i32
    return %c0_i32, %c0_i32_0 : i32, i32
  }
  func.func @transform_2(%arg0: i32) -> (i32, i32) {
    %c0_i32 = arith.constant 0 : i32
    %c0_i32_0 = arith.constant 0 : i32
    %c0_i32_1 = arith.constant 0 : i32
    return %c0_i32, %c0_i32_0 : i32, i32
  }
  func.func @transform_3(%arg0: i32) -> (i32, i32) {
    %c0_i32 = arith.constant 0 : i32
    %c0_i32_0 = arith.constant 0 : i32
    return %c0_i32, %arg0 : i32, i32
  }
  func.func @transform_4(%arg0: i32) -> (i32, i32) {
    %c0_i32 = arith.constant 0 : i32
    %c0_i32_0 = arith.constant 0 : i32
    return %c0_i32, %arg0 : i32, i32
  }
}

</mosaic_0001>

<bundles_post_ra>
// kernel: tpu_custom_call.1
= control target key start
LH: loop header
LB: loop body
LE: loop exit
PB: predicated region body
PF: predicated region fallthrough
CT: control target
= control target key end

     0   :  { %10 = vsyncpa [#allocation3], 0  ;;  %s939_s0 = inlined_call_operand.vmem [shape: f32[4,256], index: 0, kind: input, shape index: {}]   ;;  %s940_s1 = inlined_call_operand.vmem [shape: f32[7,20], index: 1, kind: input, shape index: {}]   ;;  %s941_s2 = inlined_call_operand.vmem [shape: f32[20,7], index: 2, kind: input, shape index: {}]   ;;  %s942_s3 = inlined_call_operand.hbm [shape: f32[6,256], index: 3, kind: output, shape index: {0}]   ;;  %s943_s4 = inlined_call_operand.hbm [shape: f32[4,256], index: 4, kind: output, shape index: {1}]  }
   0x1   :  { %12 = vsyncpa [#allocation3 + $0x1], 0 }
   0x2   :  { %13 = vsyncpa [#allocation5], 0 }
   0x3   :  { %15 = vsyncpa [#allocation5 + $0x1], 0  ;;  %s802_s15 = smov 0   ;;  %s804_s16 = smov 0  }
   0x4   :  { %s806_s17 = smov 0   ;;  %s808_s18 = smov 0  }
   0x5 LB: > { %s823_s19 = sadd.s32 4294967295, %s763_s18   ;;  %s567_s20 = sadd.s32 4294967294, %s763_s18   ;;  %s763_s18 = sphi %s808_s18, %s949_s18   ;;  %s759_s17 = sphi %s806_s17, %s948_s17   ;;  %s755_s16 = sphi %s804_s16, %s947_s16   ;;  %s751_s15 = sphi %s802_s15, %s946_s15  }
   0x6   : > { %s827_s21 = sadd.s32 1, %s763_s18   ;;  %s96_s22 = sadd.s32 1, %s759_s17 }
   0x7   : > { %s93_s23 = ssub.s32 %s763_s18, %s827_s21  ;;  %p106_p0 = scmp.ne.s32.totalorder %s759_s17, %s755_s16 }
   0x8   : > { %p94_p1 = scmp.eq.s32.totalorder %s93_s23, 0  ;;  %p107_p2 = scmp.eq.s32.totalorder %s823_s19, 1 }
   0x9   : > { %p112_p3 = scmp.ne.s32.totalorder %s755_s16, %s751_s15  ;;  %p113_p4 = scmp.eq.s32.totalorder %s567_s20, 1 }
   0xa   : > { %s838_s24 = scalar_select %p94_p1, %s759_s17, %s96_s22  }
   0xb   : > { %p840_p5 = por %p107_p2, %p106_p0  ;;  %p844_p6 = por %p113_p4, %p112_p3 }
   0xc   : > { %p570_p7 = scmp.ge.s32.totalorder %s763_s18, 1  ;;  %p170_p8 = scmp.lt.s32.totalorder %s763_s18, 3 }
   0xe   : > { %p171_p9 = pnand %p570_p7, %p170_p8 }
   0xf   : > { %p200_p10 = scmp.lt.s32.totalorder (!%p171_p9), %s823_s19, 1  ;;  %s767_s6 = smov (!%p171_p9), 127  }
  0x10   : > { %174 = sbr.rel (%p171_p9) target bundleno = 749 (0x2ed), region = 32  ;;  %s768_s7 = smov (!%p171_p9), 125  }
  0x11   : > { %s769_s8 = smov (!%p171_p9), 126   ;;  %s770_s9 = smov (!%p171_p9), 124  }
  0x12   : > { %s869_s12 = sand.u32 (!%p171_p9), 1, %s755_s16   ;;  %s583_s30 = sshll.u32 (!%p171_p9), %s823_s19, 7 }
  0x13   : > { %s571_s13 = sshll.u32 (!%p171_p9), %s869_s12, 3  ;;  %s771_s11 = smov (!%p171_p9), [#allocation2]  }
  0x14   : > { %s192_s22 = scalar_lea.vmem (!%p171_p9), [#allocation2], %s571_s13  ;;  %s677_s13 = sshll.u32 (!%p171_p9), %s771_s11, 4  ;;  %s678_s13 = int_to_ptr.vmem [resolvable:$false] %s677_s13 }
  0x15   : > { %v765_v0 = vmov 0.0   ;;  %s201_s27 = scalar_select %p200_p10, %s823_s19, 1  ;;  %vm766_vm0 = vmmov 0   ;;  %vm223_vm1 = vcmask 1043456   ;;  %v205_v9 = vld [vmem:[%s940_s1] sm:$0x7f]  ;;  %v323_v30 = vlaneseq }
  0x16   : > { %595 = vmatprep.subr.mxu0 %v765_v0  ;;  %604 = vmatprep.subr.mxu1 %v765_v0  ;;  %vm226_vm2 = vcmask 162816   ;;  %vm303_vm3 = vcmask 1045504   ;;  %vm341_vm5 = vcmask 1046528   ;;  %v206_v37 = vld [vmem:[%s941_s2] sm:$0xff]  ;;  %vm331_vm6 = vcmask 56320   ;;  %v207_v38 = vld [vmem:[%s941_s2 + $0x8] sm:$0xff] }
  0x17   : > { %601 = vmatprep.mubr.msk.f32.mxu0 %vm766_vm0, %v765_v0  ;;  %606 = vmatprep.mubr.msk.f32.mxu1 %vm766_vm0, %v765_v0  ;;  %s573_s28 = sshll.u32 %s201_s27, 2  ;;  %v324_v31 = vand.u32 127, %v323_v30  ;;  %v208_v39 = vld [vmem:[%s941_s2 + $0x10] sm:$0xf]  ;;  %s679_s14 = scalar_lea.vmem %s678_s13, 256 }
  0x18   : > { %s203_s5 = scalar_lea.vmem %s939_s0, %s573_s28 }
  0x19   : > { %v204_v1 = vld [vmem:[%s203_s5] sm:$0xf]  ;;  %vm325_vm4 = vcmp.lt.s32.totalorder %v324_v31, 28  ;;  %s463_s5 = sshll.u32 %s192_s22, 4  ;;  %s464_s5 = int_to_ptr.vmem [resolvable:$true] %s463_s5 }
  0x1a   : > { %209 = vrot.lane.b32.xlu1 %v204_v1, %s767_s6  ;;  %213 = vrot.lane.b32.xlu0 %v204_v1, %s768_s7  ;;  %v576_v34 = vsel %vm325_vm4, 1.0, %v765_v0  ;;  %s673_s10 = scalar_lea.vmem %s464_s5, 128  ;;  %p680_p0 = scmp.lt.s32.totalorder %s464_s5, %s678_s13 }
  0x1b   : > { %p674_p11 = scmp.ne.s32.totalorder %s464_s5, %s673_s10  ;;  %p681_p1 = scmp.lt.s32.totalorder %s679_s14, %s673_s10 }
  0x1d   : > { %p675_p12 = pnand %p674_p11, %p840_p5  ;;  %p682_p2 = por %p681_p1, %p680_p0 }
  0x1e   : > { %211 = vrot.lane.b32.xlu1 %v204_v1, %s769_s8  ;;  %215 = vrot.lane.b32.xlu0 %v204_v1, %s770_s9  ;;  %s461_s8 = scalar_lea.hbm %s942_s3, %s583_s30  ;;  %s445_s9 = scalar_lea.sflag [#allocation3], %s869_s12 }
  0x1f   : > { %p676_p13 = pneg %p675_p12 }
  0x21   : > { %p683_p3 = pnand %p682_p2, %p676_p13 }
  0x8c   : > { %v210_v2 = vpop.permute.xlu1 %209  ;;  %v214_v3 = vpop.permute.xlu0 %213 }
  0x8d   : > { %v221_v4 = vrot.slane %v214_v3, 4  ;;  %v218_v5 = vrot.slane %v210_v2, 4 }
  0x8f   : > { %v224_v10 = vsel %vm223_vm1, %v204_v1, %v218_v5 }
  0x90   : > { %v212_v6 = vpop.permute.xlu1 %211  ;;  %v216_v7 = vpop.permute.xlu0 %215 }
  0x91   : > { %596 = vmatpush3.msk.msra.mxu0 %vm223_vm1, %v216_v7  ;;  %v225_v8 = vsel %vm223_vm1, %v212_v6, %v221_v4 }
  0x92   : > { %597 = vmatprep.subr.mxu0 %v765_v0 }
  0x93   : > { %598 = vmatpush3.msra.mxu0 %v225_v8 }
  0x94   : > { %599 = vmatprep.subr.mxu0 %v765_v0 }
  0x95   : > { %600 = vmatpush3.msra.mxu0 %v224_v10 }
  0x96   : > { %602 = vmatmul.mubr.msk.f32.vlgmr.msra.gmra.mxu0 %vm226_vm2, %v205_v9 }
 0x156   : > { %v299_v11 = vpop.f32.mrf.mxu0 }
 0x157   : > { %v304_v12 = vsel %vm303_vm3, %v299_v11, -inf }
 0x158   : > { %v305_v13 = vrot.slane %v304_v12, 4  ;;  %v603_v14 = vpop.f32.mrf.mxu0 }
 0x15a   : > { %v306_v15 = vmax.f32 %v304_v12, %v305_v13 }
 0x15c   : > { %v307_v16 = vrot.slane %v306_v15, 2 }
 0x15e   : > { %v308_v17 = vmax.f32 %v306_v15, %v307_v16 }
 0x160   : > { %v309_v18 = vrot.slane %v308_v17, 1 }
 0x162   : > { %v310_v19 = vmax.f32 %v308_v17, %v309_v18 }
 0x164   : > { %v311_v20 = vsub.f32 %v299_v11, %v310_v19 }
 0x166   : > { %v312_v21 = vmul.f32 1.442695, %v311_v20 }
 0x168   : > { %669 = vpow2.f32 %v312_v21 }
 0x175   : > { %v670_v22 = vpop.eup %669 }
 0x176   : > { %v314_v23 = vsel %vm303_vm3, %v670_v22, 0.0 }
 0x177   : > { %v315_v24 = vrot.slane %v314_v23, 4 }
 0x179   : > { %v316_v25 = vadd.f32 %v315_v24, %v314_v23 }
 0x17b   : > { %v317_v26 = vrot.slane %v316_v25, 2 }
 0x17d   : > { %v318_v27 = vadd.f32 %v317_v26, %v316_v25 }
 0x17f   : > { %v319_v28 = vrot.slane %v318_v27, 1 }
 0x181   : > { %v320_v29 = vadd.f32 %v319_v28, %v318_v27 }
 0x183   : > { %671 = vrcp.f32 %v320_v29 }
 0x190   : > { %v672_v32 = vpop.eup %671 }
 0x191   : > { %v322_v33 = vmul.f32 %v672_v32, %v670_v22 }
 0x193   : > { %v328_v35 = vsel %vm303_vm3, %v322_v33, %v299_v11 }
 0x194   : > { %v329_v36 = vmul.f32 %v576_v34, %v328_v35 }
 0x196   : > { %605 = vmatpush3.msk.msra.mxu1 %vm341_vm5, %v329_v36  ;;  %330 = vst [vmem:[%s192_s22] sm:$0x3f] %v329_v36 }
 0x197   : > { %607 = vmatmul.mubr.msk.f32.vlgmr.msra.gmra.mxu1 %vm331_vm6, %v206_v37 }
 0x198   : > { %609 = vmatprep.mubr.msk.f32.mxu1 %vm766_vm0, %v765_v0 }
 0x19b   : > { %610 = vmatmul.mubr.msk.f32.gmra.mxu1 %vm331_vm6, %v207_v38 }
 0x19c   : > { %612 = vmatprep.mubr.msk.f32.mxu1 %vm766_vm0, %v765_v0 }
 0x19f   : > { %613 = vmatmul.mubr.msk.f32.gmra.mxu1 %vm331_vm6, %v208_v39 }
 0x257   : > { %v411_v40 = vpop.f32.mrf.mxu1 }
 0x258   : > { %686 = shalt.err (!%p683_p3)
}
 0x259   : > { %s687_s20 = scalar_lea.hbm %s461_s8, 128  ;;  %s691_s27 = scalar_lea.hbm %s942_s3, 256 }
 0x25a   : > { %p688_p4 = scmp.ne.s32.totalorder %s461_s8, %s687_s20  ;;  %p692_p9 = scmp.lt.s32.totalorder %s461_s8, %s942_s3 }
 0x25b   : > { %p693_p10 = scmp.lt.s32.totalorder %s691_s27, %s687_s20 }
 0x25c   : > { %p689_p7 = pnand %p688_p4, %p840_p5 }
 0x25d   : > { %p694_p11 = por %p693_p10, %p692_p9 }
 0x25e   : > { %p690_p8 = pneg %p689_p7 }
 0x260   : > { %p695_p12 = pnand %p694_p11, %p690_p8 }
 0x262   : > { %698 = shalt.err (!%p695_p12)
}
 0x263   : > { %615 = dma.vmem_to_hbm [thread:$0]  (%p840_p5), %s464_s5, 128, %s461_s8, %s445_s9   ;;  %v426_v41 = vrot.slane %v411_v40, 4  ;;  %v608_v42 = vpop.f32.mrf.mxu1 }
 0x264   : > { %s772_s30 = smov 1   ;;  %s773_s6 = smov 2  }
 0x265   : > { %428 = vrot.lane.b32.xlu0 %v426_v41, %s772_s30  ;;  %v416_v43 = vpop.f32.mrf.mxu1  ;;  %s774_s7 = smov 3   ;;  %s775_s10 = smov 4  }
 0x266   : > { %v435_v44 = vrot.slane %v416_v43, 4  ;;  %431 = vrot.lane.b32.xlu1 %v416_v43, %s773_s6  ;;  %s572_s11 = sshll.u32 %s869_s12, 2  ;;  %s584_s5 = sshll.u32 %s823_s19, 6 }
 0x267   : > { %v611_v45 = vpop.f32.mrf.mxu1  ;;  %s199_s8 = scalar_lea.vmem [#allocation4], %s572_s11  ;;  %s474_s20 = scalar_lea.hbm %s943_s4, %s584_s5 }
 0x268   : > { %s476_s9 = sshll.u32 %s199_s8, 4  ;;  %s450_s22 = scalar_lea.sflag [#allocation5], %s869_s12  ;;  %s477_s9 = int_to_ptr.vmem [resolvable:$true] %s476_s9 }
 0x269   : > { %437 = vrot.lane.b32.xlu0 %v435_v44, %s774_s7  ;;  %v421_v46 = vpop.f32.mrf.mxu1  ;;  %s699_s23 = scalar_lea.vmem %s477_s9, 64  ;;  %s776_s27 = smov [#allocation4]  }
 0x26a   : > { %440 = vrot.lane.b32.xlu1 %v421_v46, %s775_s10  ;;  %p700_p13 = scmp.ne.s32.totalorder %s477_s9, %s699_s23  ;;  %s703_s28 = sshll.u32 %s776_s27, 4  ;;  %s704_s28 = int_to_ptr.vmem [resolvable:$false] %s703_s28 }
 0x26b   : > { %v614_v47 = vpop.f32.mrf.mxu1  ;;  %s705_s19 = scalar_lea.vmem %s704_s28, 128  ;;  %p706_p2 = scmp.lt.s32.totalorder %s477_s9, %s704_s28 }
 0x26c   : > { %p701_p0 = pnand %p700_p13, %p840_p5  ;;  %p707_p3 = scmp.lt.s32.totalorder %s705_s19, %s699_s23 }
 0x26e   : > { %p702_p1 = pneg %p701_p0  ;;  %p708_p4 = por %p707_p3, %p706_p2 }
 0x270   : > { %p709_p7 = pnand %p708_p4, %p702_p1 }
 0x2d7   : > { %v429_v48 = vpop.permute.xlu0 %428 }
 0x2d8   : > { %v430_v49 = vadd.f32 %v429_v48, %v411_v40  ;;  %v432_v50 = vpop.permute.xlu1 %431 }
 0x2da   : > { %v433_v51 = vadd.f32 %v432_v50, %v430_v49 }
 0x2db   : > { %v438_v52 = vpop.permute.xlu0 %437 }
 0x2dc   : > { %v439_v53 = vadd.f32 %v438_v52, %v433_v51  ;;  %v441_v54 = vpop.permute.xlu1 %440 }
 0x2de   : > { %v442_v55 = vadd.f32 %v441_v54, %v439_v53 }
 0x2e0   : > { %443 = vst [vmem:[%s199_s8] sm:$0xf] %v442_v55 }
 0x2e1   : > { %712 = shalt.err (!%p709_p7)
}
 0x2e2   : > { %s713_s29 = scalar_lea.hbm %s474_s20, 64  ;;  %s717_s6 = scalar_lea.hbm %s943_s4, 128 }
 0x2e3   : > { %p714_p8 = scmp.ne.s32.totalorder %s474_s20, %s713_s29  ;;  %p718_p11 = scmp.lt.s32.totalorder %s474_s20, %s943_s4 }
 0x2e4   : > { %p719_p12 = scmp.lt.s32.totalorder %s717_s6, %s713_s29 }
 0x2e5   : > { %p715_p9 = pnand %p714_p8, %p840_p5 }
 0x2e6   : > { %p720_p13 = por %p719_p12, %p718_p11 }
 0x2e7   : > { %p716_p10 = pneg %p715_p9 }
 0x2e9   : > { %p721_p0 = pnand %p720_p13, %p716_p10 }
 0x2eb   : > { %724 = shalt.err (!%p721_p0)
}
 0x2ec   : > { %616 = dma.vmem_to_hbm [thread:$0]  (%p840_p5), %s477_s9, 64, %s474_s20, %s450_s22  }
 0x2ed PF: > { %p626_p1 = scmp.ge.s32.totalorder %s763_s18, 2  ;;  %s488_s11 = sand.u32 1, %s751_s15  }
 0x2ee   : > { %s489_s5 = scalar_lea.sflag [#allocation3], %s488_s11 }
 0x2ef   : > { %p620_p2 = pnand %p626_p1, %p844_p6 }
 0x2f1   : > { %p621_p3 = pneg %p620_p2 }
 0x2f3   : > { %742 = dma.done.wait (%p621_p3), %s489_s5, 128  }
 0x2f4   : > { %744 = vsyncadd (%p621_p3), %s489_s5, 4294967168  ;;  %s498_s8 = scalar_lea.sflag [#allocation5], %s488_s11 }
 0x2f5   : > { %746 = dma.done.wait (%p621_p3), %s498_s8, 64  }
 0x2f6   : > { %748 = vsyncadd (%p621_p3), %s498_s8, 4294967232  ;;  %p18_p5 = scmp.ge.s32.totalorder %s827_s21, 4   ;;  %s946_s15 = smov %s755_s16 }
 0x2f7   : > { %s947_s16 = smov %s759_s17  ;;  %s948_s17 = smov %s838_s24 }
 0x2f8   : > { %s949_s18 = smov %s827_s21  ;;  %20 = sbr.rel (!%p18_p5) target bundleno = 5 (0x5), region = 84 }
 0x2fd   :  { %503 = vsyncpa [#allocation3], 1 }
 0x2fe   :  { %505 = vsyncpa [#allocation3 + $0x1], 1 }
 0x2ff   :  { %506 = vsyncpa [#allocation5], 1 }
 0x300   :  { %508 = vsyncpa [#allocation5 + $0x1], 1 }

</bundles_post_ra>
